<compile_context>
chip_gen: v6e
topology: v6e:2x2x1
jax: 0.10.0
libtpu: 0.0.40
codegen_flags: <defaults>
</compile_context>

<pallas_src>
import functools

import jax
import jax.numpy as jnp
from jax.experimental import pallas as pl
from jax.experimental.pallas import tpu as pltpu


# ---------------------------------------------------------------------------
# Kernels
# ---------------------------------------------------------------------------

def lstm_step_kernel(x_ref, hc0_ref, w_ref, bss_ref, hc1_ref):
    """One LSTMCell step.  State is a packed (B, 2H) [h | c] slab.

    w_ref   : (In+H, 4H) = [W_ih^T ; W_hh^T], pre-scaled per gate column
              (0.5 on i/f/o columns for the sigmoid-via-tanh trick).
    bss_ref : (3, 4H) rows = [fused bias (pre-scaled), post scale, post shift].
    """
    In = x_ref.shape[-1]
    H = hc0_ref.shape[-1] // 2
    h0 = hc0_ref[:, :H]
    c0 = hc0_ref[:, H:]
    # Two MXU pushes on static slices of the fused weight; avoids any
    # host-side concat([x, h0]) round trip before the kernel.
    gates = (jnp.dot(x_ref[...], w_ref[:In, :], preferred_element_type=jnp.float32)
             + jnp.dot(h0, w_ref[In:, :], preferred_element_type=jnp.float32)
             + bss_ref[0:1, :])
    # Lane-dense activation over the whole (B, 4H) slab:
    #   i/f/o lanes -> sigmoid (= 0.5*tanh(0.5*x) + 0.5), g lanes -> tanh.
    act = jnp.tanh(gates) * bss_ref[1:2, :] + bss_ref[2:3, :]
    i_g = act[:, 0 * H:1 * H]
    f_g = act[:, 1 * H:2 * H]
    g_g = act[:, 2 * H:3 * H]
    o_g = act[:, 3 * H:4 * H]
    # NOTE: with 4H == 128 the gate slab is one vreg; a pltpu.roll-based
    # formulation could avoid the narrow 32-lane slices (minor XLU-for-VPU win).
    c1 = f_g * c0 + i_g * g_g
    h1 = o_g * jnp.tanh(c1)
    hc1_ref[...] = jnp.concatenate([h1, c1], axis=-1).astype(hc1_ref.dtype)


def lstm_seq_kernel(xproj_ref, w_h_ref, ss_ref, hc0_ref, hseq_ref, hc_ref,
                    h_scr, c_scr):
    """Whole-sequence LSTM: one grid step per time step (grid=(T,), arbitrary).

    xproj_ref : (1, B, 4H) precomputed x_t @ W_ih^T + bias (pre-scaled).
    w_h_ref   : (H, 4H)    W_hh^T (pre-scaled), VMEM-resident across T.
    ss_ref    : (2, 4H)    post-tanh [scale; shift] rows.
    hc0_ref   : (B, 2H)    initial [h | c] state.
    hseq_ref  : (1, B, H)  per-step h output.
    hc_ref    : (B, 2H)    final [h | c] state (resident, written back at end).
    h_scr/c_scr : (B, H)   VMEM-carried recurrent state (never touches HBM).
    """
    t = pl.program_id(0)
    H = h_scr.shape[-1]

    @pl.when(t == 0)
    def _():
        h_scr[...] = hc0_ref[:, :H]
        c_scr[...] = hc0_ref[:, H:]

    gates = xproj_ref[0] + jnp.dot(h_scr[...], w_h_ref[...],
                                   preferred_element_type=jnp.float32)
    act = jnp.tanh(gates) * ss_ref[0:1, :] + ss_ref[1:2, :]
    i_g = act[:, 0 * H:1 * H]
    f_g = act[:, 1 * H:2 * H]
    g_g = act[:, 2 * H:3 * H]
    o_g = act[:, 3 * H:4 * H]
    c1 = f_g * c_scr[...] + i_g * g_g
    h1 = o_g * jnp.tanh(c1)
    h_scr[...] = h1
    c_scr[...] = c1
    hseq_ref[0] = h1.astype(hseq_ref.dtype)
    hc_ref[...] = jnp.concatenate([h1, c1], axis=-1).astype(hc_ref.dtype)


# ---------------------------------------------------------------------------
# Wrappers
# ---------------------------------------------------------------------------

def _full_spec(shape):
    return pl.BlockSpec(shape, lambda: (0,) * len(shape))


@functools.partial(jax.jit, donate_argnums=(1,))
def lstm_step(x, hc0, w_fused, bss):
    B, In = x.shape
    H = hc0.shape[-1] // 2
    cost = pl.CostEstimate(
        flops=2 * B * (In + H) * 4 * H + 10 * B * H,
        transcendentals=B * 5 * H,
        bytes_accessed=4 * (x.size + 2 * hc0.size + w_fused.size + bss.size),
    )
    return pl.pallas_call(
        lstm_step_kernel,
        out_shape=jax.ShapeDtypeStruct((B, 2 * H), jnp.float32),
        grid=(),
        in_specs=[_full_spec(x.shape), _full_spec(hc0.shape),
                  _full_spec(w_fused.shape), _full_spec(bss.shape)],
        out_specs=_full_spec((B, 2 * H)),
        input_output_aliases={1: 0},   # update the tiny [h|c] slab in place
        cost_estimate=cost,
    )(x, hc0, w_fused, bss)


@jax.jit
def lstm_sequence(x_seq, hc0, w_x, w_h, bias, ss):
    T, B, In = x_seq.shape
    H = w_h.shape[0]
    # Whole-sequence input projection as ONE MXU-friendly matmul
    # (T*B rows instead of T separate 8-row pushes).
    xproj = jnp.einsum('tbi,ig->tbg', x_seq, w_x,
                       preferred_element_type=jnp.float32,
                       precision=jax.lax.Precision.HIGHEST) + bias
    return pl.pallas_call(
        lstm_seq_kernel,
        out_shape=(jax.ShapeDtypeStruct((T, B, H), jnp.float32),
                   jax.ShapeDtypeStruct((B, 2 * H), jnp.float32)),
        grid=(T,),
        in_specs=[pl.BlockSpec((1, B, 4 * H), lambda t: (t, 0, 0)),
                  pl.BlockSpec((H, 4 * H), lambda t: (0, 0)),
                  pl.BlockSpec((2, 4 * H), lambda t: (0, 0)),
                  pl.BlockSpec((B, 2 * H), lambda t: (0, 0))],
        out_specs=(pl.BlockSpec((1, B, H), lambda t: (t, 0, 0)),
                   pl.BlockSpec((B, 2 * H), lambda t: (0, 0))),
        scratch_shapes=[pltpu.VMEM((B, H), jnp.float32),
                        pltpu.VMEM((B, H), jnp.float32)],
        # T is a true recurrence -> "arbitrary".  (On v7x, independent
        # sequences/layers/directions could add a leading "parallel" axis to
        # occupy the second TensorCore.)
        compiler_params=pltpu.CompilerParams(dimension_semantics=("arbitrary",)),
    )(xproj, w_h, ss, hc0)


# ---------------------------------------------------------------------------
# Module mirroring the PyTorch `lstm` (stateful per-step LSTMCell)
# ---------------------------------------------------------------------------

class LSTMModule:
    def __init__(self, input_size, hidden_size, key):
        self.input_size = input_size
        self.hidden_size = hidden_size
        H = hidden_size

        k1, k2, k3, k4 = jax.random.split(key, 4)
        bound = 1.0 / (hidden_size ** 0.5)
        u = lambda k, s: jax.random.uniform(k, s, jnp.float32, -bound, bound)
        # Raw nn.LSTMCell-layout parameters (kept for reference checking).
        self.w_ih = u(k1, (4 * H, input_size))
        self.w_hh = u(k2, (4 * H, H))
        self.b_ih = u(k3, (4 * H,))
        self.b_hh = u(k4, (4 * H,))

        # --- One-time weight prep (hoisted out of the per-step path) -------
        # sigmoid(x) = 0.5*tanh(0.5*x) + 0.5 on the i/f/o gate columns:
        # the PRE scale (0.5) is baked into W and bias; the POST scale/shift
        # is applied after the single lane-dense tanh.  Kept as separate
        # constants so changing the activation trick cannot silently break.
        half = jnp.full((H,), 0.5, jnp.float32)
        one = jnp.full((H,), 1.0, jnp.float32)
        zero = jnp.zeros((H,), jnp.float32)
        pre_scale = jnp.concatenate([half, half, one, half])                 # (4H,)
        post_scale = jnp.concatenate([half, half, one, half]).reshape(1, 4 * H)
        post_shift = jnp.concatenate([half, half, zero, half]).reshape(1, 4 * H)

        self.w_x = (self.w_ih.T * pre_scale).astype(jnp.float32)            # (In, 4H)
        self.w_h = (self.w_hh.T * pre_scale).astype(jnp.float32)            # (H, 4H)
        self.w_fused = jnp.concatenate([self.w_x, self.w_h], axis=0)        # (In+H, 4H)
        self.bias = ((self.b_ih + self.b_hh) * pre_scale).reshape(1, 4 * H)
        self.bss = jnp.concatenate([self.bias, post_scale, post_shift], 0)  # (3, 4H)
        self.ss = jnp.concatenate([post_scale, post_shift], axis=0)         # (2, 4H)

        self.hc = None
        self.first_flag = True

    # -- state helpers -------------------------------------------------------
    def reset_state(self):
        self.hc = None
        self.first_flag = True

    @property
    def h(self):
        return None if self.hc is None else self.hc[:, :self.hidden_size]

    @property
    def c(self):
        return None if self.hc is None else self.hc[:, self.hidden_size:]

    def _state(self, batch):
        if self.first_flag or self.hc is None:
            return jnp.zeros((batch, 2 * self.hidden_size), jnp.float32)
        return self.hc

    # -- per-step forward (same semantics as the PyTorch module) -------------
    def __call__(self, x):
        x = jnp.asarray(x, jnp.float32)
        hc0 = self._state(x.shape[0])
        self.hc = lstm_step(x, hc0, self.w_fused, self.bss)
        self.first_flag = False
        return self.h

    # -- fused whole-sequence forward (one pallas_call, grid=(T,)) -----------
    def forward_sequence(self, x_seq):
        x_seq = jnp.asarray(x_seq, jnp.float32)
        hc0 = self._state(x_seq.shape[1])
        h_seq, self.hc = lstm_sequence(x_seq, hc0, self.w_x, self.w_h,
                                       self.bias, self.ss)
        self.first_flag = False
        return h_seq


# ---------------------------------------------------------------------------
# Pure-JAX reference (nn.LSTMCell semantics) for verification
# ---------------------------------------------------------------------------

def _lstm_cell_ref(x, h0, c0, w_ih, w_hh, b_ih, b_hh):
    H = w_hh.shape[1]
    hp = jax.lax.Precision.HIGHEST
    gates = (jnp.dot(x, w_ih.T, precision=hp)
             + jnp.dot(h0, w_hh.T, precision=hp) + b_ih + b_hh)
    i = jax.nn.sigmoid(gates[:, 0 * H:1 * H])
    f = jax.nn.sigmoid(gates[:, 1 * H:2 * H])
    g = jnp.tanh(gates[:, 2 * H:3 * H])
    o = jax.nn.sigmoid(gates[:, 3 * H:4 * H])
    c1 = f * c0 + i * g
    h1 = o * jnp.tanh(c1)
    return h1, c1


if __name__ == "__main__":
    batch, input_size, hidden_size, seq_len = 8, 32, 32, 6
    key = jax.random.PRNGKey(0)
    k_param, k_x = jax.random.split(key)

    model = LSTMModule(input_size, hidden_size, k_param)
    x_seq = jax.random.normal(k_x, (seq_len, batch, input_size), jnp.float32)
    z = jnp.zeros((batch, hidden_size), jnp.float32)

    # --- per-step path (PyTorch module forward semantics) -------------------
    h1 = jax.block_until_ready(model(x_seq[0]))          # first call: zero state
    h1_ref, c1_ref = _lstm_cell_ref(x_seq[0], z, z, model.w_ih, model.w_hh,
                                    model.b_ih, model.b_hh)
    assert h1.shape == (batch, hidden_size)
    assert jnp.allclose(h1, h1_ref, atol=1e-4, rtol=1e-4)
    assert jnp.allclose(model.c, c1_ref, atol=1e-4, rtol=1e-4)

    h2 = jax.block_until_ready(model(x_seq[1]))          # carried state
    h2_ref, c2_ref = _lstm_cell_ref(x_seq[1], h1_ref, c1_ref, model.w_ih,
                                    model.w_hh, model.b_ih, model.b_hh)
    assert jnp.allclose(h2, h2_ref, atol=1e-4, rtol=1e-4)
    assert jnp.allclose(model.c, c2_ref, atol=1e-4, rtol=1e-4)

    # --- fused whole-sequence path (one pallas_call, grid=(T,)) -------------
    model.reset_state()
    h_seq = jax.block_until_ready(model.forward_sequence(x_seq))
    assert h_seq.shape == (seq_len, batch, hidden_size)

    h_ref, c_ref = z, z
    for t in range(seq_len):
        h_ref, c_ref = _lstm_cell_ref(x_seq[t], h_ref, c_ref, model.w_ih,
                                      model.w_hh, model.b_ih, model.b_hh)
        assert jnp.allclose(h_seq[t], h_ref, atol=1e-4, rtol=1e-4)
    assert jnp.allclose(model.h, h_ref, atol=1e-4, rtol=1e-4)
    assert jnp.allclose(model.c, c_ref, atol=1e-4, rtol=1e-4)

    print("KERNEL_OK")
</pallas_src>

<mosaic_0001>
module attributes {stable_mosaic.version = 11 : i64} {
  func.func @lstm_step_kernel(%arg0: memref<8x32xf32, #tpu.memory_space<vmem>>, %arg1: memref<8x64xf32, #tpu.memory_space<vmem>>, %arg2: memref<64x128xf32, #tpu.memory_space<vmem>>, %arg3: memref<3x128xf32, #tpu.memory_space<vmem>>, %arg4: memref<8x64xf32, #tpu.memory_space<vmem>>) attributes {dimension_semantics = [], scalar_prefetch = 0 : i64, scratch_operands = 0 : i64, tpu.core_type = #tpu.core_type<tc>} {
    %c0 = arith.constant 0 : index
    %c0_0 = arith.constant 0 : index
    %0 = vector.load %arg1[%c0, %c0_0] : memref<8x64xf32, #tpu.memory_space<vmem>>, vector<8x32xf32>
    %c0_1 = arith.constant 0 : index
    %c32 = arith.constant 32 : index
    %1 = vector.load %arg1[%c0_1, %c32] : memref<8x64xf32, #tpu.memory_space<vmem>>, vector<8x32xf32>
    %c0_2 = arith.constant 0 : index
    %c0_3 = arith.constant 0 : index
    %2 = vector.load %arg0[%c0_2, %c0_3] : memref<8x32xf32, #tpu.memory_space<vmem>>, vector<8x32xf32>
    %c0_4 = arith.constant 0 : index
    %c0_5 = arith.constant 0 : index
    %3 = vector.load %arg2[%c0_4, %c0_5] : memref<64x128xf32, #tpu.memory_space<vmem>>, vector<32x128xf32>
    %cst = arith.constant dense<0.000000e+00> : vector<8x128xf32>
    %4 = tpu.matmul %2, %3, %cst {dimension_numbers = #tpu.dot_dimension_numbers<[1], [0], [0], [1], [0, 0, 1, 1], [], []>} : vector<8x32xf32>, vector<32x128xf32>, vector<8x128xf32> -> vector<8x128xf32>
    %c32_6 = arith.constant 32 : index
    %c0_7 = arith.constant 0 : index
    %5 = vector.load %arg2[%c32_6, %c0_7] : memref<64x128xf32, #tpu.memory_space<vmem>>, vector<32x128xf32>
    %cst_8 = arith.constant dense<0.000000e+00> : vector<8x128xf32>
    %6 = tpu.matmul %0, %5, %cst_8 {dimension_numbers = #tpu.dot_dimension_numbers<[1], [0], [0], [1], [0, 0, 1, 1], [], []>} : vector<8x32xf32>, vector<32x128xf32>, vector<8x128xf32> -> vector<8x128xf32>
    %7 = arith.addf %4, %6 : vector<8x128xf32>
    %c0_9 = arith.constant 0 : index
    %c0_10 = arith.constant 0 : index
    %8 = vector.load %arg3[%c0_9, %c0_10] : memref<3x128xf32, #tpu.memory_space<vmem>>, vector<1x128xf32>
    %9 = vector.broadcast %8 : vector<1x128xf32> to vector<8x128xf32>
    %10 = arith.addf %7, %9 : vector<8x128xf32>
    %11 = math.tanh %10 : vector<8x128xf32>
    %c1 = arith.constant 1 : index
    %c0_11 = arith.constant 0 : index
    %12 = vector.load %arg3[%c1, %c0_11] : memref<3x128xf32, #tpu.memory_space<vmem>>, vector<1x128xf32>
    %13 = vector.broadcast %12 : vector<1x128xf32> to vector<8x128xf32>
    %14 = arith.mulf %11, %13 : vector<8x128xf32>
    %c2 = arith.constant 2 : index
    %c0_12 = arith.constant 0 : index
    %15 = vector.load %arg3[%c2, %c0_12] : memref<3x128xf32, #tpu.memory_space<vmem>>, vector<1x128xf32>
    %16 = vector.broadcast %15 : vector<1x128xf32> to vector<8x128xf32>
    %17 = arith.addf %14, %16 : vector<8x128xf32>
    %18 = vector.extract_strided_slice %17 {offsets = [0, 0], sizes = [8, 32], strides = [1, 1]} : vector<8x128xf32> to vector<8x32xf32>
    %19 = vector.extract_strided_slice %17 {offsets = [0, 32], sizes = [8, 32], strides = [1, 1]} : vector<8x128xf32> to vector<8x32xf32>
    %20 = vector.extract_strided_slice %17 {offsets = [0, 64], sizes = [8, 32], strides = [1, 1]} : vector<8x128xf32> to vector<8x32xf32>
    %21 = vector.extract_strided_slice %17 {offsets = [0, 96], sizes = [8, 32], strides = [1, 1]} : vector<8x128xf32> to vector<8x32xf32>
    %22 = arith.mulf %19, %1 : vector<8x32xf32>
    %23 = arith.mulf %18, %20 : vector<8x32xf32>
    %24 = arith.addf %22, %23 : vector<8x32xf32>
    %25 = math.tanh %24 : vector<8x32xf32>
    %26 = arith.mulf %21, %25 : vector<8x32xf32>
    %27 = tpu.concatenate %26, %24 in 1 : vector<8x32xf32>, vector<8x32xf32> -> vector<8x64xf32>
    %c0_13 = arith.constant 0 : index
    %c0_14 = arith.constant 0 : index
    %28 = vector.load %arg4[%c0_13, %c0_14] : memref<8x64xf32, #tpu.memory_space<vmem>>, vector<8x64xf32>
    tpu.vector_store %arg4[%c0_13, %c0_14], %27 {strides = array<i32>} : memref<8x64xf32, #tpu.memory_space<vmem>>, vector<8x64xf32>,
    return
  }
}

</mosaic_0001>

<bundles_post_ra>
// kernel: lstm_step.1
= control target key start
LH: loop header
LB: loop body
LE: loop exit
PB: predicated region body
PF: predicated region fallthrough
CT: control target
= control target key end

     0   :  { %9 = vsyncpa [#allocation3], 0  ;;  %s467_s0 = inlined_call_operand.hbm [shape: f32[8,32], index: 0, kind: input, shape index: {}]   ;;  %s468_s1 = inlined_call_operand.hbm [shape: f32[8,64], index: 1, kind: input, shape index: {}, may-alias: {1,4}]   ;;  %s469_s2 = inlined_call_operand.hbm [shape: f32[64,128], index: 2, kind: input, shape index: {}]   ;;  %s470_s3 = inlined_call_operand.vmem [shape: f32[3,128], index: 3, kind: input, shape index: {}]   ;;  %s471_s4 = inlined_call_operand.hbm [shape: f32[8,64], index: 4, kind: output, shape index: {}, may-alias: {1,4}]  }
   0x1   :  { %10 = vsyncpa [#allocation6], 0 }
   0x2   :  { %11 = vsyncpa [#allocation4], 0  ;;  %s408_s15 = smov [#allocation5]   ;;  %s409_s17 = smov [#allocation2]  }
   0x3   :  { %s28_s16 = sshll.u32 %s408_s15, 4  ;;  %s18_s18 = sshll.u32 %s409_s17, 4  ;;  %s29_s16 = int_to_ptr.vmem [resolvable:$true] %s28_s16  ;;  %s19_s18 = int_to_ptr.vmem [resolvable:$true] %s18_s18 }
   0x4   :  { %s330_s19 = scalar_lea.vmem %s29_s16, 128  ;;  %p335_p1 = scmp.lt.s32.totalorder %s29_s16, %s29_s16 }
   0x5   :  { %p331_p0 = scmp.ne.s32.totalorder %s29_s16, %s330_s19  ;;  %p336_p2 = scmp.lt.s32.totalorder %s330_s19, %s330_s19 }
   0x7   :  { %p337_p3 = por %p336_p2, %p335_p1 }
   0x9   :  { %p338_p4 = pnand %p337_p3, %p331_p0 }
   0xb   :  { %341 = shalt.err (!%p338_p4)
}
   0xc   :  { %31 = dma.hbm_to_vmem [thread:$0]  %s468_s1, 128, %s29_s16, [#allocation6]  }
   0xd   :  { %s350_s22 = scalar_lea.vmem %s19_s18, 128  ;;  %p355_p6 = scmp.lt.s32.totalorder %s19_s18, %s19_s18 }
   0xe   :  { %p351_p5 = scmp.ne.s32.totalorder %s19_s18, %s350_s22  ;;  %p356_p7 = scmp.lt.s32.totalorder %s350_s22, %s350_s22 }
  0x10   :  { %p357_p8 = por %p356_p7, %p355_p6 }
  0x12   :  { %p358_p9 = pnand %p357_p8, %p351_p5 }
  0x14   :  { %361 = shalt.err (!%p358_p9)
}
  0x15   :  { %21 = dma.hbm_to_vmem [thread:$0]  %s467_s0, 128, %s19_s18, [#allocation3]  }
  0x16   :  { %s410_s25 = smov [#allocation7]  }
  0x17   :  { %s37_s26 = sshll.u32 %s410_s25, 4  ;;  %s38_s26 = int_to_ptr.vmem [resolvable:$true] %s37_s26 }
  0x18   :  { %s370_s27 = scalar_lea.vmem %s38_s26, 1024  ;;  %p375_p11 = scmp.lt.s32.totalorder %s38_s26, %s38_s26 }
  0x19   :  { %p371_p10 = scmp.ne.s32.totalorder %s38_s26, %s370_s27  ;;  %p376_p12 = scmp.lt.s32.totalorder %s370_s27, %s370_s27 }
  0x1b   :  { %p377_p13 = por %p376_p12, %p375_p11 }
  0x1d   :  { %p378_p0 = pnand %p377_p13, %p371_p10 }
  0x1f   :  { %381 = shalt.err (!%p378_p0)
}
  0x20   :  { %s411_s1 = smov 128   ;;  %s412_s28 = smov 8  }
  0x21   :  { %43 = dma.hbm_to_vmem [thread:$0]  %s469_s2, 1024, %s38_s26, [#allocation6], %s411_s1, %s411_s1, %s412_s28  }
  0x22   :  { %402 = dma.done.wait [#allocation3], 128  }
  0x23   :  { %403 = vsyncadd [#allocation3], 4294967168 }
  0x24   :  { %404 = dma.done.wait [#allocation6], 1152  }
  0x25   :  { %405 = vsyncadd [#allocation6], 4294966144  ;;  %v413_v0 = vmov 0.0   ;;  %vm414_vm0 = vmmov 0   ;;  %v64_v1 = vld [vmem:[#allocation7 + $0x38] sm:$0xff]  ;;  %v63_v3 = vld [vmem:[#allocation7 + $0x30] sm:$0xff] }
  0x26   :  { %286 = vmatprep.subr.mxu0 %v413_v0  ;;  %297 = vmatprep.subr.mxu1 %v413_v0  ;;  %v60_v2 = vld [vmem:[#allocation7 + $0x18] sm:$0xff]  ;;  %v59_v4 = vld [vmem:[#allocation7 + $0x10] sm:$0xff]  ;;  %v62_v5 = vld [vmem:[#allocation7 + $0x28] sm:$0xff]  ;;  %vm65_vm1 = vcmask 261120   ;;  %s415_s9 = smov 64   ;;  %s416_s10 = smov 32  }
  0x27   :  { %294 = vmatprep.mubr.msk.f32.mxu0 %vm414_vm0, %v413_v0  ;;  %305 = vmatprep.mubr.msk.f32.mxu1 %vm414_vm0, %v413_v0  ;;  %v58_v6 = vld [vmem:[#allocation7 + $0x8] sm:$0xff]  ;;  %v61_v7 = vld [vmem:[#allocation7 + $0x20] sm:$0xff]  ;;  %v55_v9 = vld [vmem:[#allocation5] sm:$0xff]  ;;  %s417_s11 = smov [#allocation8]   ;;  %vm253_vm2 = vcmask 523264  }
  0x28   :  { %287 = vmatpush3.msra.mxu0 %v64_v1  ;;  %298 = vmatpush3.msra.mxu1 %v60_v2  ;;  %v57_v8 = vld [vmem:[#allocation7] sm:$0xff]  ;;  %v56_v10 = vld [vmem:[#allocation2] sm:$0xff]  ;;  %s261_s12 = sshll.u32 %s417_s11, 4  ;;  %s262_s12 = int_to_ptr.vmem [resolvable:$true] %s261_s12 }
  0x29   :  { %288 = vmatprep.subr.mxu0 %v413_v0  ;;  %299 = vmatprep.subr.mxu1 %v413_v0  ;;  %v273_v13 = vld [vmem:[%s470_s3] ss:$0 sm:$0xff]  ;;  %v274_v18 = vld [vmem:[%s470_s3 + $0x1] ss:$0 sm:$0xff]  ;;  %v275_v20 = vld [vmem:[%s470_s3 + $0x2] ss:$0 sm:$0xff]  ;;  %p387_p2 = scmp.lt.s32.totalorder %s262_s12, %s262_s12 }
  0x2a   :  { %289 = vmatpush3.msra.mxu0 %v63_v3  ;;  %300 = vmatpush3.msra.mxu1 %v59_v4  ;;  %s382_s3 = scalar_lea.vmem %s262_s12, 128 }
  0x2b   :  { %290 = vmatprep.subr.mxu0 %v413_v0  ;;  %301 = vmatprep.subr.mxu1 %v413_v0  ;;  %p383_p1 = scmp.ne.s32.totalorder %s262_s12, %s382_s3  ;;  %p388_p3 = scmp.lt.s32.totalorder %s382_s3, %s382_s3 }
  0x2c   :  { %291 = vmatpush3.msra.mxu0 %v62_v5  ;;  %302 = vmatpush3.msra.mxu1 %v58_v6 }
  0x2d   :  { %292 = vmatprep.subr.mxu0 %v413_v0  ;;  %303 = vmatprep.subr.mxu1 %v413_v0  ;;  %p389_p4 = por %p388_p3, %p387_p2 }
  0x2e   :  { %293 = vmatpush3.msra.mxu0 %v61_v7  ;;  %304 = vmatpush3.msra.mxu1 %v57_v8 }
  0x2f   :  { %295 = vmatmul.mubr.msk.f32.vlgmr.msra.gmra.mxu0 %vm65_vm1, %v55_v9  ;;  %306 = vmatmul.mubr.msk.f32.vlgmr.msra.gmra.mxu1 %vm65_vm1, %v56_v10  ;;  %p390_p5 = pnand %p389_p4, %p383_p1 }
  0xef   :  { %v135_v11 = vpop.f32.mrf.mxu0  ;;  %v208_v12 = vpop.f32.mrf.mxu1 }
  0xf0   :  { %v209_v14 = vadd.f32 %v208_v12, %v135_v11 }
  0xf1   :  { %v296_v15 = vpop.f32.mrf.mxu0  ;;  %v307_v16 = vpop.f32.mrf.mxu1 }
  0xf2   :  { %v217_v17 = vadd.f32 %v273_v13, %v209_v14 }
  0xf4   :  { %318 = vtanh.f32 %v217_v17 }
 0x101   :  { %v319_v19 = vpop.eup %318 }
 0x102   :  { %v224_v21 = vmul.f32 %v319_v19, %v274_v18 }
 0x104   :  { %v230_v22 = vadd.f32 %v275_v20, %v224_v21 }
 0x106   :  { %233 = vrot.lane.b32.xlu0 %v230_v22, %s415_s9  ;;  %v231_v25 = vmul.f32 %v230_v22, %v55_v9 }
 0x178   :  { %v234_v23 = vpop.permute.xlu0 %233 }
 0x179   :  { %v236_v24 = vmul.f32 %v234_v23, %v230_v22 }
 0x17b   :  { %238 = vrot.lane.b32.xlu0 %v236_v24, %s416_s10 }
 0x1ed   :  { %v239_v26 = vpop.permute.xlu0 %238 }
 0x1ee   :  { %v241_v27 = vadd.f32 %v239_v26, %v231_v25 }
 0x1f0   :  { %320 = vtanh.f32 %v241_v27 }
 0x1fd   :  { %v321_v28 = vpop.eup %320 }
 0x1fe   :  { %244 = vrot.lane.b32.xlu1 %v321_v28, %s415_s9 }
 0x270   :  { %v245_v29 = vpop.permute.xlu1 %244 }
 0x271   :  { %v247_v30 = vmul.f32 %v245_v29, %v230_v22 }
 0x273   :  { %249 = vrot.lane.b32.xlu1 %v247_v30, %s416_s10 }
 0x2e5   :  { %v250_v31 = vpop.permute.xlu1 %249 }
 0x2e6   :  { %v252_v32 = vsel %vm65_vm1, %v250_v31, %v241_v27 }
 0x2e7   :  { %254 = vst.msk [vmem:[#allocation8] sm:$0xff] %vm253_vm2, %v252_v32 }
 0x2e8   :  { %393 = shalt.err (!%p390_p5)
}
 0x2e9   :  { %264 = dma.vmem_to_hbm [thread:$0]  %s262_s12, 128, %s471_s4, [#allocation4]  }
 0x2ea   :  { %406 = dma.done.wait [#allocation4], 128  }
 0x2eb   :  { %407 = vsyncadd [#allocation4], 4294967168 }
 0x2ec   :  { %268 = vsyncpa [#allocation3], 1 }
 0x2ed   :  { %269 = vsyncpa [#allocation6], 1 }
 0x2ee   :  { %270 = vsyncpa [#allocation4], 1 }

</bundles_post_ra>
